<compile_context>
chip_gen: v7x
topology: tpu7x:2x2x1
jax: 0.10.0
libtpu: 0.0.40
codegen_flags: <defaults>
</compile_context>

<pallas_src>
import math

import jax
import jax.numpy as jnp
from jax import lax
from jax.experimental import pallas as pl
from jax.experimental.pallas import tpu as pltpu


def relation_linear_kernel(bd_ref, rel_ref, w_ref, b_ref, out_ref):
    # bd_ref : VMEM (B, 3) int32        batch triples; column 1 = relation id
    # rel_ref: VMEM (num_rel, H) f32    relation embedding table (resident)
    # w_ref  : VMEM (TN, H) f32         nn.Linear weight tile (PyTorch layout)
    # b_ref  : VMEM (1, TN) f32         bias tile
    # out_ref: VMEM (B, TN) f32         output tile
    B = bd_ref.shape[0]
    num_rel = rel_ref.shape[0]

    # Extract relation-id column (col 1) as a (B, 1) vector via masked reduce
    # (avoids unaligned lane slicing).
    bd = bd_ref[...]
    col = lax.broadcasted_iota(jnp.int32, bd.shape, 1)
    idx = jnp.sum(jnp.where(col == 1, bd, 0), axis=1, keepdims=True)  # (B, 1)

    # One-hot gather on the MXU: (B, num_rel) @ (num_rel, H) -> (B, H).
    onehot = (
        lax.broadcasted_iota(jnp.int32, (B, num_rel), 1) == idx
    ).astype(jnp.float32)
    gathered = jnp.dot(onehot, rel_ref[...], preferred_element_type=jnp.float32)

    # Linear: contract on H directly against the (TN, H) weight tile — no
    # transpose of the weight anywhere.
    out = lax.dot_general(
        gathered,
        w_ref[...],
        dimension_numbers=(((1,), (1,)), ((), ())),
        preferred_element_type=jnp.float32,
    )
    out_ref[...] = out + b_ref[...]


def relation_linear(batch_data, rel_emb, weight, bias, *, tn=512):
    """Pallas equivalent of Relation_Linear.forward(batch_data).

    batch_data: (B, 3) int  | rel_emb: (num_rel, H) f32
    weight:     (num_ent, H) f32 (PyTorch nn.Linear layout)
    bias:       (1, num_ent) f32 (or (num_ent,), reshaped here if needed)
    """
    B = batch_data.shape[0]
    num_rel, hidden_dim = rel_emb.shape
    num_ent = weight.shape[0]

    if bias.ndim == 1:  # prefer storing bias as (1, num_ent) at init (no-op then)
        bias = bias.reshape(1, num_ent)

    # Lane-dense num_ent tile. If num_ent < tn, use the full extent (still a
    # legal block because it equals the array dim).
    tn = min(tn, num_ent)
    grid = (pl.cdiv(num_ent, tn),)

    grid_spec = pltpu.PrefetchScalarGridSpec(
        num_scalar_prefetch=0,
        grid=grid,
        in_specs=[
            pl.BlockSpec((B, 3), lambda j: (0, 0)),                 # batch_data (whole)
            pl.BlockSpec((num_rel, hidden_dim), lambda j: (0, 0)),  # rel_emb   (whole)
            pl.BlockSpec((tn, hidden_dim), lambda j: (j, 0)),       # weight tile
            pl.BlockSpec((1, tn), lambda j: (0, j)),                # bias tile
        ],
        out_specs=pl.BlockSpec((B, tn), lambda j: (0, j)),          # output tile
    )

    return pl.pallas_call(
        relation_linear_kernel,
        out_shape=jax.ShapeDtypeStruct((B, num_ent), jnp.float32),
        grid_spec=grid_spec,
        compiler_params=pltpu.CompilerParams(
            dimension_semantics=("parallel",),  # tiles independent -> megacore on v7x
        ),
    )(batch_data.astype(jnp.int32), rel_emb, weight, bias)


def init_params(key, num_ent, num_rel, hidden_dim):
    """Deterministic parameter init matching the module's shapes/init style.

    bias is stored as (1, num_ent) so no per-call reshape is needed.
    """
    k1, k2, k3 = jax.random.split(key, 3)
    # xavier_uniform_ with gain = calculate_gain('relu') = sqrt(2)
    gain = math.sqrt(2.0)
    bound_rel = gain * math.sqrt(6.0 / (num_rel + hidden_dim))
    rel_emb = jax.random.uniform(
        k1, (num_rel, hidden_dim), jnp.float32, -bound_rel, bound_rel
    )
    # nn.Linear default: kaiming-uniform weight, uniform bias in +-1/sqrt(fan_in)
    bound_w = 1.0 / math.sqrt(hidden_dim)
    weight = jax.random.uniform(
        k2, (num_ent, hidden_dim), jnp.float32, -bound_w, bound_w
    )
    bias = jax.random.uniform(k3, (1, num_ent), jnp.float32, -bound_w, bound_w)
    return rel_emb, weight, bias


if __name__ == "__main__":
    # Small but non-trivial: num_ent=1024 with tn=512 exercises a 2-step,
    # parallel, pipelined grid over the weight.
    num_ent, num_rel, hidden_dim = 1024, 16, 128
    B = 8

    key = jax.random.PRNGKey(0)
    kp, kd = jax.random.split(key)
    rel_emb, weight, bias = init_params(kp, num_ent, num_rel, hidden_dim)

    # batch_data: (B, 3) = (head, relation, tail) indices
    batch_data = jax.random.randint(
        kd, (B, 3), minval=0, maxval=num_rel, dtype=jnp.int32
    )

    out = relation_linear(batch_data, rel_emb, weight, bias)
    out = jax.block_until_ready(out)

    # reference (plain JAX) check
    ref = rel_emb[batch_data[:, 1]] @ weight.T + bias  # bias (1, num_ent) broadcasts
    assert out.shape == (B, num_ent)
    assert jnp.allclose(out, ref, atol=1e-4, rtol=1e-4), "mismatch vs reference"

    print("KERNEL_OK")
</pallas_src>

<mosaic_0001>
module attributes {stable_mosaic.version = 11 : i64} {
  func.func @relation_linear_kernel(%arg0: i32, %arg1: memref<8x3xi32, #tpu.memory_space<vmem>>, %arg2: memref<16x128xf32, #tpu.memory_space<vmem>>, %arg3: memref<512x128xf32, #tpu.memory_space<vmem>>, %arg4: memref<1x512xf32, #tpu.memory_space<vmem>>, %arg5: memref<8x512xf32, #tpu.memory_space<vmem>>) attributes {dimension_semantics = [#tpu.dimension_semantics<parallel>], iteration_bounds = array<i64: 2>, scalar_prefetch = 0 : i64, scratch_operands = 0 : i64, tpu.core_type = #tpu.core_type<tc>, window_params = [{pipeline_mode = #tpu.pipeline_mode<synchronous>, transform_indices = @transform_0, window_bounds = array<i64: 8, 3>}, {pipeline_mode = #tpu.pipeline_mode<synchronous>, transform_indices = @transform_1, window_bounds = array<i64: 16, 128>}, {transform_indices = @transform_2, window_bounds = array<i64: 512, 128>}, {transform_indices = @transform_3, window_bounds = array<i64: 1, 512>}, {transform_indices = @transform_4, window_bounds = array<i64: 8, 512>}]} {
    %c0 = arith.constant 0 : index
    %c0_0 = arith.constant 0 : index
    %0 = vector.load %arg1[%c0, %c0_0] : memref<8x3xi32, #tpu.memory_space<vmem>>, vector<8x3xi32>
    %1 = tpu.iota {dimensions = array<i32: 1>} : vector<8x3xi32>
    %c1_i32 = arith.constant 1 : i32
    %2 = vector.broadcast %c1_i32 : i32 to vector<8x3xi32>
    %3 = arith.cmpi eq, %1, %2 : vector<8x3xi32>
    %c0_i32 = arith.constant 0 : i32
    %4 = vector.broadcast %c0_i32 : i32 to vector<8x3xi32>
    %5 = arith.select %3, %0, %4 : vector<8x3xi1>, vector<8x3xi32>
    %cst = arith.constant dense<0> : vector<8xi32>
    %6 = vector.multi_reduction <add>, %5, %cst [1] : vector<8x3xi32> to vector<8xi32>
    %7 = vector.shape_cast %6 : vector<8xi32> to vector<8x1xi32>
    %8 = tpu.iota {dimensions = array<i32: 1>} : vector<8x16xi32>
    %9 = vector.broadcast %7 : vector<8x1xi32> to vector<8x16xi32>
    %10 = arith.cmpi eq, %8, %9 : vector<8x16xi32>
    %11 = arith.extui %10 : vector<8x16xi1> to vector<8x16xi32>
    %12 = arith.sitofp %11 : vector<8x16xi32> to vector<8x16xf32>
    %c0_1 = arith.constant 0 : index
    %c0_2 = arith.constant 0 : index
    %13 = vector.load %arg2[%c0_1, %c0_2] : memref<16x128xf32, #tpu.memory_space<vmem>>, vector<16x128xf32>
    %cst_3 = arith.constant dense<0.000000e+00> : vector<8x128xf32>
    %14 = tpu.matmul %12, %13, %cst_3 {dimension_numbers = #tpu.dot_dimension_numbers<[1], [0], [0], [1], [0, 0, 1, 1], [], []>} : vector<8x16xf32>, vector<16x128xf32>, vector<8x128xf32> -> vector<8x128xf32>
    %c0_4 = arith.constant 0 : index
    %c0_5 = arith.constant 0 : index
    %15 = vector.load %arg3[%c0_4, %c0_5] : memref<512x128xf32, #tpu.memory_space<vmem>>, vector<512x128xf32>
    %cst_6 = arith.constant dense<0.000000e+00> : vector<8x512xf32>
    %16 = tpu.matmul %14, %15, %cst_6 {dimension_numbers = #tpu.dot_dimension_numbers<[1], [1], [0], [0], [0, 0, 1, 0], [], []>} : vector<8x128xf32>, vector<512x128xf32>, vector<8x512xf32> -> vector<8x512xf32>
    %c0_7 = arith.constant 0 : index
    %c0_8 = arith.constant 0 : index
    %17 = vector.load %arg4[%c0_7, %c0_8] : memref<1x512xf32, #tpu.memory_space<vmem>>, vector<1x512xf32>
    %18 = vector.broadcast %17 : vector<1x512xf32> to vector<8x512xf32>
    %19 = arith.addf %16, %18 : vector<8x512xf32>
    %c0_9 = arith.constant 0 : index
    %c0_10 = arith.constant 0 : index
    %20 = vector.load %arg5[%c0_9, %c0_10] : memref<8x512xf32, #tpu.memory_space<vmem>>, vector<8x512xf32>
    tpu.vector_store %arg5[%c0_9, %c0_10], %19 {strides = array<i32>} : memref<8x512xf32, #tpu.memory_space<vmem>>, vector<8x512xf32>,
    return
  }
  func.func @transform_0(%arg0: i32) -> (i32, i32) {
    %c0_i32 = arith.constant 0 : i32
    %c0_i32_0 = arith.constant 0 : i32
    %c0_i32_1 = arith.constant 0 : i32
    return %c0_i32, %c0_i32_0 : i32, i32
  }
  func.func @transform_1(%arg0: i32) -> (i32, i32) {
    %c0_i32 = arith.constant 0 : i32
    %c0_i32_0 = arith.constant 0 : i32
    %c0_i32_1 = arith.constant 0 : i32
    return %c0_i32, %c0_i32_0 : i32, i32
  }
  func.func @transform_2(%arg0: i32) -> (i32, i32) {
    %c0_i32 = arith.constant 0 : i32
    %c0_i32_0 = arith.constant 0 : i32
    return %arg0, %c0_i32 : i32, i32
  }
  func.func @transform_3(%arg0: i32) -> (i32, i32) {
    %c0_i32 = arith.constant 0 : i32
    %c0_i32_0 = arith.constant 0 : i32
    return %c0_i32, %arg0 : i32, i32
  }
  func.func @transform_4(%arg0: i32) -> (i32, i32) {
    %c0_i32 = arith.constant 0 : i32
    %c0_i32_0 = arith.constant 0 : i32
    return %c0_i32, %arg0 : i32, i32
  }
}

</mosaic_0001>

<bundles_post_ra>
// kernel: tpu_custom_call.1
= control target key start
LH: loop header
LB: loop body
LE: loop exit
PB: predicated region body
PF: predicated region fallthrough
CT: control target
= control target key end

     0   :  { %9 = vsyncpa [#allocation3], 0  ;;  %s1366_s0 = inlined_call_operand.vmem [shape: s32[8,3], index: 0, kind: input, shape index: {}]   ;;  %s1367_s1 = inlined_call_operand.hbm [shape: f32[16,128], index: 1, kind: input, shape index: {}]   ;;  %s1368_s2 = inlined_call_operand.hbm [shape: f32[1024,128], index: 2, kind: input, shape index: {}]   ;;  %s1369_s3 = inlined_call_operand.vmem [shape: f32[1,1024], index: 3, kind: input, shape index: {}]   ;;  %s1370_s4 = inlined_call_operand.hbm [shape: f32[8,1024], index: 4, kind: output, shape index: {}]  }
   0x1   :  { %10 = vsyncpa [#allocation6], 0 }
   0x2   :  { %12 = vsyncpa [#allocation6 + $0x1], 0 }
   0x3   :  { %13 = vsyncpa [#allocation4], 0 }
   0x4   :  { %15 = vsyncpa [#allocation4 + $0x1], 0  ;;  %s1079_s15 = smov 0   ;;  %s1081_s16 = smov 0  }
   0x5   :  { %s1083_s17 = smov 0   ;;  %s1085_s18 = smov 0  }
   0x6 LB: > { %s1100_s19 = sadd.s32 4294967295, %s1044_s18   ;;  %s688_s20 = sadd.s32 4294967294, %s1044_s18   ;;  %s1044_s18 = sphi %s1085_s18, %s1390_s18   ;;  %s1040_s17 = sphi %s1083_s17, %s1389_s17   ;;  %s1036_s16 = sphi %s1081_s16, %s1388_s16   ;;  %s1032_s15 = sphi %s1079_s15, %s1387_s15  }
   0x7   : > { %p83_p0 = scmp.ne.s32.totalorder %s1036_s16, %s1032_s15  ;;  %p1371_p1 = scmp.eq.s32.totalorder %s1100_s19, 0 }
   0x8   : > { %p139_p3 = scmp.eq.s32.totalorder %s688_s20, 1  ;;  %p689_p5 = scmp.ge.s32.totalorder %s1044_s18, 1 }
   0x9   : > { %p1109_p4 = por %p1371_p1, %p83_p0  ;;  %p146_p7 = scmp.lt.s32.totalorder %s1044_s18, 3 }
   0xa   : > { %p1114_p6 = por %p139_p3, %p83_p0  ;;  %s1046_s24 = smov [#allocation2]  }
   0xb   : > { %s1374_s21 = scalar_select %p1109_p4, 1, 0 }
   0xc   : > { %s1375_s22 = scalar_select %p1114_p6, 1, 0 }
   0xd   : > { %p1119_p8 = pnand %p689_p5, %p146_p7  ;;  %s161_s25 = sshll.u32 %s1046_s24, 4  ;;  %s1123_s25 = int_to_ptr.vmem [resolvable:$true] %s161_s25 }
   0xe   : > { %s1135_s27 = sadd.s32 1, %s1044_s18   ;;  %s70_s28 = sadd.s32 1, %s1040_s17 }
   0xf   : > { %s1376_s23 = scalar_select %p1119_p8, 1, 0 }
  0x10   : > { %p862_p9 = pneg %p1119_p8  ;;  %s67_s29 = ssub.s32 %s1044_s18, %s1135_s27 }
  0x11   : > { %s916_s6 = scalar_lea.hbm %s1367_s1, 256 }
  0x12   : > { %p1130_p11 = pnand %p862_p9, %p1371_p1  ;;  %p917_p12 = scmp.ne.s32.totalorder %s1367_s1, %s916_s6 }
  0x13   : > { %p923_p5 = scmp.lt.u32.totalorder %s916_s6, %s1367_s1 }
  0x14   : > { %p918_p13 = pneg %p1130_p11 }
  0x16   : > { %p919_p0 = pnand %p918_p13, %p917_p12 }
  0x18   : > { %p920_p3 = pneg %p919_p0 }
  0x1a   : > { %p925_p7 = pnand %p923_p5, %p920_p3 }
  0x1c   : > { %928 = shalt.err (!%p925_p7)
}
  0x1d   : > { %s929_s11 = scalar_lea.vmem %s1123_s25, 256  ;;  %p937_p2 = scmp.lt.s32.totalorder %s1123_s25, %s1123_s25 }
  0x1e   : > { %p930_p9 = scmp.ne.s32.totalorder %s1123_s25, %s929_s11  ;;  %p938_p6 = scmp.lt.s32.totalorder %s929_s11, %s929_s11 }
  0x20   : > { %p932_p10 = pnand %p930_p9, %p918_p13  ;;  %p939_p4 = por %p938_p6, %p937_p2 }
  0x22   : > { %p933_p1 = pneg %p932_p10 }
  0x24   : > { %p940_p8 = pnand %p939_p4, %p933_p1 }
  0x26   : > { %943 = shalt.err (!%p940_p8)
}
  0x27   : > { %s1047_s12 = smov 128   ;;  %s1048_s13 = smov 8  }
  0x28   : > { %865 = dma.hbm_to_vmem [thread:$0]  (!%p1130_p11), %s1367_s1, 256, %s1123_s25, [#allocation3], %s1047_s12, %s1047_s12, %s1048_s13  }
  0x29   : > { %p68_p1 = scmp.eq.s32.totalorder %s67_s29, 0  ;;  %p77_p2 = scmp.ne.s32.totalorder %s1040_s17, %s1036_s16 }
  0x2a   : > { %p78_p4 = scmp.eq.s32.totalorder %s1044_s18, 0  ;;  %p875_p6 = scmp.lt.s32.totalorder %s1044_s18, 2 }
  0x2b   : > { %s1169_s24 = scalar_select %p68_p1, %s1040_s17, %s70_s28  }
  0x2c   : > { %p79_p8 = por %p78_p4, %p77_p2  ;;  %p1378_p10 = scmp.eq.s32.totalorder %s1100_s19, 1 }
  0x2d   : > { %s175_s26 = sand.u32 1, %s1040_s17   ;;  %s707_s5 = sshll.u32 %s1044_s18, 13 }
  0x2e   : > { %p1173_p12 = por %p1378_p10, %p77_p2  ;;  %s692_s6 = sshll.u32 %s175_s26, 9 }
  0x2f   : > { %s1182_s9 = scalar_lea.hbm %s1368_s2, %s707_s5  ;;  %s179_s25 = scalar_lea.vmem [#allocation5], %s692_s6 }
  0x30   : > { %s186_s28 = sshll.u32 %s179_s25, 4  ;;  %p1184_p11 = pnand %p875_p6, %p79_p8  ;;  %s1188_s28 = int_to_ptr.vmem [resolvable:$true] %s186_s28 }
  0x31   : > { %s1190_s10 = scalar_lea.sflag [#allocation6], %s175_s26  ;;  %s944_s11 = scalar_lea.hbm %s1182_s9, 8192 }
  0x32   : > { %p945_p13 = scmp.ne.s32.totalorder %s1182_s9, %s944_s11  ;;  %p946_p0 = pneg %p1184_p11 }
  0x33   : > { %s949_s5 = scalar_lea.hbm %s1368_s2, 16384  ;;  %p950_p7 = scmp.lt.u32.totalorder %s1182_s9, %s1368_s2 }
  0x34   : > { %p947_p3 = pnand %p946_p0, %p945_p13  ;;  %p951_p9 = scmp.lt.u32.totalorder %s949_s5, %s944_s11 }
  0x35   : > { %p953_p2 = scmp.lt.u32.totalorder %s944_s11, %s1182_s9 }
  0x36   : > { %p948_p5 = pneg %p947_p3  ;;  %p952_p1 = por %p951_p9, %p950_p7 }
  0x38   : > { %p954_p4 = por %p953_p2, %p952_p1 }
  0x3a   : > { %p955_p6 = pnand %p954_p4, %p948_p5 }
  0x3c   : > { %958 = shalt.err (!%p955_p6)
}
  0x3d   : > { %s959_s26 = scalar_lea.vmem %s1188_s28, 8192  ;;  %s1049_s8 = smov [#allocation5]  }
  0x3e   : > { %p960_p8 = scmp.ne.s32.totalorder %s1188_s28, %s959_s26  ;;  %s964_s25 = sshll.u32 %s1049_s8, 4  ;;  %s965_s25 = int_to_ptr.vmem [resolvable:$false] %s964_s25 }
  0x3f   : > { %s966_s14 = scalar_lea.vmem %s965_s25, 16384  ;;  %p967_p3 = scmp.lt.s32.totalorder %s1188_s28, %s965_s25 }
  0x40   : > { %p962_p10 = pnand %p960_p8, %p946_p0  ;;  %p968_p7 = scmp.lt.s32.totalorder %s966_s14, %s959_s26 }
  0x42   : > { %p963_p13 = pneg %p962_p10  ;;  %p969_p9 = por %p968_p7, %p967_p3 }
  0x44   : > { %p970_p1 = pnand %p969_p9, %p963_p13 }
  0x46   : > { %973 = shalt.err (!%p970_p1)
}
  0x47   : > { %869 = dma.hbm_to_vmem [thread:$0]  (!%p1184_p11), %s1182_s9, 8192, %s1188_s28, %s1190_s10, %s1047_s12, %s1047_s12, %s1048_s13  }
  0x48   : > { %p1381_p0 = scmp.ne.s32.totalorder %s1376_s23, 0 }
  0x49   : > { %p1382_p5 = scmp.eq.s32.totalorder (!%p1381_p0), %s1100_s19, 0 }
  0x4a   : > { %206 = sbr.rel (%p1381_p0) target bundleno = 691 (0x2b3), region = 36 }
  0x51   : > { %1019 = dma.done.wait (%p1382_p5), [#allocation3], 256   ;;  %p1383_p2 = pmov %p1382_p5 }
  0x52   : > { %s1228_s11 = sand.u32 1, %s1036_s16   ;;  %p1384_p11 = scmp.ne.s32.totalorder %s1374_s21, 0 }
  0x53   : > { %1021 = vsyncadd (%p1383_p2), [#allocation3], 4294967040  ;;  %s697_s29 = sshll.u32 %s1228_s11, 9  ;;  %s213_s20 = scalar_lea.sflag [#allocation6], %s1228_s11 }
  0x54   : > { %s1232_s5 = scalar_lea.vmem [#allocation5], %s697_s29 }
  0x55   : > { %1023 = dma.done.wait (%p1384_p11), %s213_s20, 8192  }
  0x56   : > { %1025 = vsyncadd (%p1384_p11), %s213_s20, 4294959104  ;;  %v253_v0 = vlaneseq  ;;  %vm257_vm1 = vcmask 23552   ;;  %v252_v2 = vld [vmem:[%s1366_s0] sm:$0xff]  ;;  %v274_v9 = vld [vmem:[#allocation2] sm:$0xff]  ;;  %v1050_v12 = vmov 0.0|0.0   ;;  %vm1051_vm2 = vmmov 0  }
  0x57   : > { %v275_v10 = vld [vmem:[#allocation2 + $0x8] sm:$0xff]  ;;  %787 = vmatprep.subr.bf16.mxu0 %v1050_v12  ;;  %v1052_v13 = vmov 0.0   ;;  %v366_v14 = vld [vmem:[%s1232_s5 + $0x80] sm:$0xff]  ;;  %v367_v15 = vld [vmem:[%s1232_s5 + $0x88] sm:$0xff]  ;;  %vm276_vm3 = vcmask 130048   ;;  %s699_s21 = sshll.u32 %s1100_s19, 2 }
  0x58   : > { %v1239_v1 = vand.u32 127, %v253_v0  ;;  %v788_v11 = vpack.c.bf16 %v275_v10, %v274_v9  ;;  %784 = vmatprep.mubr.msk.f32.mxu0 %vm1051_vm2, %v1052_v13  ;;  %v398_v16 = vld [vmem:[%s1232_s5 + $0x180] sm:$0xff]  ;;  %v790_v17 = vpack.c.bf16 %v367_v15, %v366_v14  ;;  %v399_v18 = vld [vmem:[%s1232_s5 + $0x188] sm:$0xff]  ;;  %v368_v23 = vld [vmem:[%s1232_s5 + $0x90] sm:$0xff]  ;;  %p247_p4 = scmp.lt.s32.totalorder %s699_s21, 7  ;;  %s698_s10 = sshll.u32 %s1228_s11, 5 }
  0x59   : > { %v350_v19 = vld [vmem:[%s1232_s5] sm:$0xff]  ;;  %v351_v20 = vld [vmem:[%s1232_s5 + $0x8] sm:$0xff]  ;;  %v822_v21 = vpack.c.bf16 %v399_v18, %v398_v16  ;;  %v369_v24 = vld [vmem:[%s1232_s5 + $0x98] sm:$0xff]  ;;  %s708_s6 = sshll.u32 %s1100_s19, 9  ;;  %s244_s7 = scalar_lea.vmem [#allocation7], %s698_s10 }
  0x5a   : > { %vm255_vm0 = vcmp.eq.s32.totalorder %v1239_v1, 1  ;;  %789 = vmatpush3.bf16.msra.mxu0 %v788_v11  ;;  %v792_v22 = vpack.c.bf16 %v351_v20, %v350_v19  ;;  %791 = vmatprep.subr.bf16.mxu1 %v790_v17  ;;  %v794_v25 = vpack.c.bf16 %v369_v24, %v368_v23  ;;  %v352_v26 = vld [vmem:[%s1232_s5 + $0x10] sm:$0xff]  ;;  %v353_v27 = vld [vmem:[%s1232_s5 + $0x18] sm:$0xff]  ;;  %v370_v29 = vld [vmem:[%s1232_s5 + $0xa0] sm:$0xff]  ;;  %s1392_s21 = smov (!%p247_p4, %s699_s21), 7  ;;  %s597_s26 = sshll.u32 %s244_s7, 4  ;;  %s1324_s26 = int_to_ptr.vmem [resolvable:$true] %s597_s26 }
  0x5b   : > { %v256_v3 = vsel %vm255_vm0, %v252_v2, 0  ;;  %823 = vmatprep.subr.bf16.mxu0 %v822_v21  ;;  %v796_v28 = vpack.c.bf16 %v353_v27, %v352_v26  ;;  %v371_v30 = vld [vmem:[%s1232_s5 + $0xa8] sm:$0xff]  ;;  %v354_v32 = vld [vmem:[%s1232_s5 + $0x20] sm:$0xff]  ;;  %v372_v35 = vld [vmem:[%s1232_s5 + $0xb0] sm:$0xff]  ;;  %s249_s28 = scalar_lea.vmem %s1369_s3, %s1392_s21  ;;  %s1322_s14 = scalar_lea.hbm %s1370_s4, %s708_s6 }
  0x5c   : > { %v258_v4 = vsel %vm257_vm1, %v256_v3, 0  ;;  %793 = vmatpush3.bf16.xpose.msra.mxu1 %v792_v22  ;;  %v798_v31 = vpack.c.bf16 %v371_v30, %v370_v29  ;;  %v355_v33 = vld [vmem:[%s1232_s5 + $0x28] sm:$0xff]  ;;  %v373_v36 = vld [vmem:[%s1232_s5 + $0xb8] sm:$0xff]  ;;  %v356_v38 = vld [vmem:[%s1232_s5 + $0x30] sm:$0xff]  ;;  %s583_s19 = scalar_lea.sflag [#allocation4], %s1228_s11  ;;  %s974_s29 = scalar_lea.vmem %s1324_s26, 512 }
  0x5d   : > { %v260_v5 = vshrl.u32 %v258_v4, 16  ;;  %v259_v6 = vand.u32 65535, %v258_v4  ;;  %795 = vmatprep.subr.bf16.mxu1 %v794_v25  ;;  %v800_v34 = vpack.c.bf16 %v355_v33, %v354_v32  ;;  %v802_v37 = vpack.c.bf16 %v373_v36, %v372_v35  ;;  %v357_v39 = vld [vmem:[%s1232_s5 + $0x38] sm:$0xff]  ;;  %v374_v41 = vld [vmem:[%s1232_s5 + $0xc0] sm:$0xff]  ;;  %v375_v42 = vld [vmem:[%s1232_s5 + $0xc8] sm:$0xff]  ;;  %p975_p6 = scmp.ne.s32.totalorder %s1324_s26, %s974_s29  ;;  %s1053_s20 = smov [#allocation7]  }
  0x5e   : > { %v804_v40 = vpack.c.bf16 %v357_v39, %v356_v38  ;;  %v806_v43 = vpack.c.bf16 %v375_v42, %v374_v41  ;;  %v358_v44 = vld [vmem:[%s1232_s5 + $0x40] sm:$0xff]  ;;  %v359_v45 = vld [vmem:[%s1232_s5 + $0x48] sm:$0xff]  ;;  %v376_v47 = vld [vmem:[%s1232_s5 + $0xd0] sm:$0xff] }
  0x5f   : > { %v262_v7 = vcvt.s32.f32 %v260_v5  ;;  %v261_v8 = vcvt.s32.f32 %v259_v6  ;;  %v808_v46 = vpack.c.bf16 %v359_v45, %v358_v44  ;;  %v377_v48 = vld [vmem:[%s1232_s5 + $0xd8] sm:$0xff]  ;;  %v360_v50 = vld [vmem:[%s1232_s5 + $0x50] sm:$0xff]  ;;  %v378_v53 = vld [vmem:[%s1232_s5 + $0xe0] sm:$0xff]  ;;  %p976_p8 = pnand %p975_p6, %p1173_p12 }
  0x60   : > { %v810_v49 = vpack.c.bf16 %v377_v48, %v376_v47  ;;  %v361_v51 = vld [vmem:[%s1232_s5 + $0x58] sm:$0xff]  ;;  %v379_v54 = vld [vmem:[%s1232_s5 + $0xe8] sm:$0xff]  ;;  %v362_v56 = vld [vmem:[%s1232_s5 + $0x60] sm:$0xff] }
  0x61   : > { %265 = vadd.xlane.f32.xlu0 %v262_v7  ;;  %v812_v52 = vpack.c.bf16 %v361_v51, %v360_v50  ;;  %v814_v55 = vpack.c.bf16 %v379_v54, %v378_v53  ;;  %v363_v57 = vld [vmem:[%s1232_s5 + $0x68] sm:$0xff]  ;;  %v380_v59 = vld [vmem:[%s1232_s5 + $0xf0] sm:$0xff]  ;;  %v381_v60 = vld [vmem:[%s1232_s5 + $0xf8] sm:$0xff]  ;;  %p977_p10 = pneg %p976_p8 }
  0x62   : > { %v816_v58 = vpack.c.bf16 %v363_v57, %v362_v56  ;;  %v818_v61 = vpack.c.bf16 %v381_v60, %v380_v59  ;;  %v364_v62 = vld [vmem:[%s1232_s5 + $0x70] sm:$0xff]  ;;  %v365_v63 = vld [vmem:[%s1232_s5 + $0x78] sm:$0xff]  ;;  %v383_v9 = vld [vmem:[%s1232_s5 + $0x108] sm:$0xff]  ;;  %v417_v56 = vshrl.u32 %v253_v0, 7 }
  0x63   : > { %v820_v2 = vpack.c.bf16 %v365_v63, %v364_v62  ;;  %v400_v10 = vld [vmem:[%s1232_s5 + $0x190] sm:$0xff]  ;;  %v401_v11 = vld [vmem:[%s1232_s5 + $0x198] sm:$0xff]  ;;  %v402_v19 = vld [vmem:[%s1232_s5 + $0x1a0] sm:$0xff] }
  0x64   : > { %797 = vmatpush3.bf16.xpose.msra.mxu1 %v796_v28  ;;  %v826_v15 = vpack.c.bf16 %v401_v11, %v400_v10  ;;  %v384_v17 = vld [vmem:[%s1232_s5 + $0x110] sm:$0xff]  ;;  %v385_v18 = vld [vmem:[%s1232_s5 + $0x118] sm:$0xff]  ;;  %v403_v20 = vld [vmem:[%s1232_s5 + $0x1a8] sm:$0xff]  ;;  %v418_v57 = vsub.s32 0, %v417_v56  ;;  %v422_v60 = vsub.s32 1, %v417_v56 }
  0x65   : > { %263 = vadd.xlane.f32.xlu0 %v261_v8  ;;  %799 = vmatprep.subr.bf16.mxu1 %v798_v31  ;;  %v382_v8 = vld [vmem:[%s1232_s5 + $0x100] sm:$0xff]  ;;  %v828_v21 = vpack.c.bf16 %v385_v18, %v384_v17  ;;  %v830_v22 = vpack.c.bf16 %v403_v20, %v402_v19  ;;  %v387_v23 = vld [vmem:[%s1232_s5 + $0x128] sm:$0xff]  ;;  %v405_v24 = vld [vmem:[%s1232_s5 + $0x1b8] sm:$0xff] }
  0x66   : > { %v824_v14 = vpack.c.bf16 %v383_v9, %v382_v8  ;;  %v388_v27 = vld [vmem:[%s1232_s5 + $0x130] sm:$0xff]  ;;  %v389_v28 = vld [vmem:[%s1232_s5 + $0x138] sm:$0xff]  ;;  %v406_v29 = vld [vmem:[%s1232_s5 + $0x1c0] sm:$0xff] }
  0x67   : > { %v407_v30 = vld [vmem:[%s1232_s5 + $0x1c8] sm:$0xff]  ;;  %v836_v31 = vpack.c.bf16 %v389_v28, %v388_v27  ;;  %v390_v33 = vld [vmem:[%s1232_s5 + $0x140] sm:$0xff]  ;;  %v408_v35 = vld [vmem:[%s1232_s5 + $0x1d0] sm:$0xff] }
  0x68   : > { %v838_v32 = vpack.c.bf16 %v407_v30, %v406_v29  ;;  %v409_v36 = vld [vmem:[%s1232_s5 + $0x1d8] sm:$0xff]  ;;  %v392_v39 = vld [vmem:[%s1232_s5 + $0x150] sm:$0xff]  ;;  %v410_v41 = vld [vmem:[%s1232_s5 + $0x1e0] sm:$0xff] }
  0x69   : > { %v842_v38 = vpack.c.bf16 %v409_v36, %v408_v35  ;;  %v411_v42 = vld [vmem:[%s1232_s5 + $0x1e8] sm:$0xff]  ;;  %v394_v45 = vld [vmem:[%s1232_s5 + $0x160] sm:$0xff]  ;;  %v412_v47 = vld [vmem:[%s1232_s5 + $0x1f0] sm:$0xff] }
  0x6a   : > { %v846_v44 = vpack.c.bf16 %v411_v42, %v410_v41  ;;  %v413_v48 = vld [vmem:[%s1232_s5 + $0x1f8] sm:$0xff]  ;;  %v396_v51 = vld [vmem:[%s1232_s5 + $0x170] sm:$0xff]  ;;  %v414_v59 = vld [vmem:[%s249_s28] sm:$0xf] }
  0x6b   : > { %v850_v50 = vpack.c.bf16 %v413_v48, %v412_v47  ;;  %v419_v62 = vrot.slane %v414_v59, %v418_v57 }
  0x6c   : > { %801 = vmatpush3.bf16.xpose.msra.mxu1 %v800_v34  ;;  %v391_v34 = vld [vmem:[%s1232_s5 + $0x148] sm:$0xff] }
  0x6d   : > { %803 = vmatprep.subr.bf16.mxu1 %v802_v37  ;;  %v840_v37 = vpack.c.bf16 %v391_v34, %v390_v33 }
  0x74   : > { %805 = vmatpush3.bf16.xpose.msra.mxu1 %v804_v40  ;;  %v393_v40 = vld [vmem:[%s1232_s5 + $0x158] sm:$0xff] }
  0x75   : > { %807 = vmatprep.subr.bf16.mxu1 %v806_v43  ;;  %v844_v43 = vpack.c.bf16 %v393_v40, %v392_v39 }
  0x7c   : > { %809 = vmatpush3.bf16.xpose.msra.mxu1 %v808_v46  ;;  %v395_v46 = vld [vmem:[%s1232_s5 + $0x168] sm:$0xff] }
  0x7d   : > { %811 = vmatprep.subr.bf16.mxu1 %v810_v49  ;;  %v848_v49 = vpack.c.bf16 %v395_v46, %v394_v45 }
  0x84   : > { %813 = vmatpush3.bf16.xpose.msra.mxu1 %v812_v52  ;;  %v397_v52 = vld [vmem:[%s1232_s5 + $0x178] sm:$0xff] }
  0x85   : > { %815 = vmatprep.subr.bf16.mxu1 %v814_v55  ;;  %v852_v53 = vpack.c.bf16 %v397_v52, %v396_v51 }
  0x8c   : > { %817 = vmatpush3.bf16.xpose.msra.mxu1 %v816_v58  ;;  %v426_v58 = vsub.s32 2, %v417_v56 }
  0x8d   : > { %819 = vmatprep.subr.bf16.mxu1 %v818_v61  ;;  %v430_v61 = vsub.s32 3, %v417_v56 }
  0x8e   : > { %v427_v63 = vrot.slane %v414_v59, %v426_v58 }
  0x94   : > { %821 = vmatpush3.bf16.xpose.msra.mxu1 %v820_v2  ;;  %v423_v2 = vrot.slane %v414_v59, %v422_v60 }
  0xee   : > { %v266_v3 = vpop.xlane.xlu0 %265 }
  0xef   : > { %v268_v4 = vcvt.f32.s32 %v266_v3  ;;  %v431_v3 = vrot.slane %v414_v59, %v430_v61 }
  0xf1   : > { %v269_v6 = vshll.u32 %v268_v4, 16 }
  0xf2   : > { %v264_v5 = vpop.xlane.xlu0 %263 }
  0xf3   : > { %v267_v7 = vcvt.f32.s32 %v264_v5 }
  0xf5   : > { %v270_v12 = vadd.s32 %v269_v6, %v267_v7 }
  0xf7   : > { %vm271_vm4 = vcmp.eq.s32.totalorder %v1239_v1, %v270_v12  ;;  %v386_v1 = vld [vmem:[%s1232_s5 + $0x120] sm:$0xff] }
  0xf8   : > { %v700_v16 = vsel %vm271_vm4, 1.0, %v1052_v13  ;;  %v404_v13 = vld [vmem:[%s1232_s5 + $0x1b0] sm:$0xff]  ;;  %v832_v25 = vpack.c.bf16 %v387_v23, %v386_v1  ;;  %s978_s5 = sshll.u32 %s1053_s20, 4  ;;  %s979_s5 = int_to_ptr.vmem [resolvable:$false] %s978_s5 }
  0xf9   : > { %785 = vmatmul.mubr.msk.f32.vlgmr.msra.gmra.mrb[0].mxu0 %vm276_vm3, %v700_v16  ;;  %v834_v26 = vpack.c.bf16 %v405_v24, %v404_v13  ;;  %s980_s23 = scalar_lea.vmem %s979_s5, 1024  ;;  %p981_p13 = scmp.lt.s32.totalorder %s1324_s26, %s979_s5 }
  0xfa   : > { %825 = vmatpush3.bf16.xpose.msra.mxu0 %v824_v14  ;;  %p982_p3 = scmp.lt.s32.totalorder %s980_s23, %s974_s29 }
  0xfb   : > { %827 = vmatprep.subr.bf16.mxu0 %v826_v15 }
  0xfc   : > { %p983_p7 = por %p982_p3, %p981_p13 }
  0xfe   : > { %p984_p9 = pnand %p983_p7, %p977_p10 }
 0x102   : > { %829 = vmatpush3.bf16.xpose.msra.mxu0 %v828_v21 }
 0x103   : > { %831 = vmatprep.subr.bf16.mxu0 %v830_v22 }
 0x10a   : > { %833 = vmatpush3.bf16.xpose.msra.mxu0 %v832_v25 }
 0x10b   : > { %835 = vmatprep.subr.bf16.mxu0 %v834_v26 }
 0x112   : > { %837 = vmatpush3.bf16.xpose.msra.mxu0 %v836_v31 }
 0x113   : > { %839 = vmatprep.subr.bf16.mxu0 %v838_v32 }
 0x11a   : > { %841 = vmatpush3.bf16.xpose.msra.mxu0 %v840_v37 }
 0x11b   : > { %843 = vmatprep.subr.bf16.mxu0 %v842_v38 }
 0x122   : > { %845 = vmatpush3.bf16.xpose.msra.mxu0 %v844_v43 }
 0x123   : > { %847 = vmatprep.subr.bf16.mxu0 %v846_v44 }
 0x12a   : > { %849 = vmatpush3.bf16.xpose.msra.mxu0 %v848_v49 }
 0x12b   : > { %851 = vmatprep.subr.bf16.mxu0 %v850_v50 }
 0x132   : > { %853 = vmatpush3.bf16.xpose.msra.mxu0 %v852_v53 }
 0x1cc   : > { %v346_v54 = vpop.f32.mrb[0].mxu0 }
 0x1cd   : > { %v786_v55 = vpop.f32.mrb[1].mxu0  ;;  %744 = vmatprep.mubr.f32.mxu1 %v346_v54  ;;  %778 = vmatprep.mubr.f32.mxu0 %v346_v54 }
 0x1ce   : > { %745 = vmatmul.mubr.f32.vlgmr.msra.gmra.mrb[0].mxu1 %v346_v54  ;;  %779 = vmatmul.mubr.f32.vlgmr.msra.gmra.mrb[2].mxu0 %v346_v54 }
 0x2a1   : > { %v502_v4 = vpop.f32.mrb[0].mxu1  ;;  %v573_v0 = vpop.f32.mrb[2].mxu0 }
 0x2a2   : > { %v503_v5 = vadd.f32 %v502_v4, %v419_v62  ;;  %v574_v6 = vadd.f32 %v573_v0, %v427_v63  ;;  %v504_v7 = vpop.f32.mrb[1].mxu1  ;;  %v575_v8 = vpop.f32.mrb[3].mxu0 }
 0x2a3   : > { %v505_v9 = vadd.f32 %v504_v7, %v423_v2  ;;  %v576_v10 = vadd.f32 %v575_v8, %v431_v3 }
 0x2a4   : > { %578 = vst [vmem:[%s244_s7] sm:$0xff] %v503_v5  ;;  %580 = vst [vmem:[%s244_s7 + $0x10] sm:$0xff] %v574_v6 }
 0x2a5   : > { %579 = vst [vmem:[%s244_s7 + $0x8] sm:$0xff] %v505_v9  ;;  %581 = vst [vmem:[%s244_s7 + $0x18] sm:$0xff] %v576_v10 }
 0x2a6   : > { %987 = shalt.err (!%p984_p9)
}
 0x2a7   : > { %s988_s11 = scalar_lea.hbm %s1322_s14, 512  ;;  %s992_s13 = scalar_lea.hbm %s1370_s4, 1024 }
 0x2a8   : > { %p989_p1 = scmp.ne.s32.totalorder %s1322_s14, %s988_s11  ;;  %p993_p2 = scmp.lt.u32.totalorder %s1322_s14, %s1370_s4 }
 0x2a9   : > { %p994_p11 = scmp.lt.u32.totalorder %s992_s13, %s988_s11  ;;  %p996_p6 = scmp.lt.u32.totalorder %s988_s11, %s1322_s14 }
 0x2aa   : > { %p990_p0 = pnand %p989_p1, %p1173_p12 }
 0x2ab   : > { %p995_p4 = por %p994_p11, %p993_p2 }
 0x2ac   : > { %p991_p5 = pneg %p990_p0 }
 0x2ad   : > { %p997_p8 = por %p996_p6, %p995_p4 }
 0x2af   : > { %p998_p10 = pnand %p997_p8, %p991_p5 }
 0x2b1   : > { %1001 = shalt.err (!%p998_p10)
}
 0x2b2   : > { %860 = dma.vmem_to_hbm [thread:$0]  (%p1173_p12), %s1324_s26, 512, %s1322_s14, %s583_s19  }
 0x2b3 PF: > { %s609_s10 = sand.u32 1, %s1032_s15   ;;  %p1385_p13 = scmp.ne.s32.totalorder %s1375_s22, 0 }
 0x2b4   : > { %p1386_p3 = scmp.ge.s32.totalorder %s1044_s18, 2  ;;  %s610_s6 = scalar_lea.sflag [#allocation4], %s609_s10 }
 0x2b6   : > { %p871_p7 = pnand %p1386_p3, %p1385_p13 }
 0x2b8   : > { %1027 = dma.done.wait (!%p871_p7), %s610_s6, 512  }
 0x2b9   : > { %1029 = vsyncadd (!%p871_p7), %s610_s6, 4294966784  ;;  %p18_p9 = scmp.ge.s32.totalorder %s1135_s27, 4   ;;  %s1387_s15 = smov %s1036_s16 }
 0x2ba   : > { %s1388_s16 = smov %s1040_s17  ;;  %s1389_s17 = smov %s1169_s24 }
 0x2bb   : > { %s1390_s18 = smov %s1135_s27  ;;  %20 = sbr.rel (!%p18_p9) target bundleno = 6 (0x6), region = 89 }
 0x2c2   :  { %615 = vsyncpa [#allocation3], 1 }
 0x2c3   :  { %617 = vsyncpa [#allocation3 + $0x1], 1 }
 0x2c4   :  { %618 = vsyncpa [#allocation6], 1 }
 0x2c5   :  { %620 = vsyncpa [#allocation6 + $0x1], 1 }
 0x2c6   :  { %621 = vsyncpa [#allocation4], 1 }
 0x2c7   :  { %623 = vsyncpa [#allocation4 + $0x1], 1 }

</bundles_post_ra>
